<compile_context>
chip_gen: v5e
topology: v5e:2x2
jax: 0.10.0
libtpu: 0.0.40
codegen_flags: <defaults>
</compile_context>

<pallas_src>
import functools

import jax
import jax.numpy as jnp
from jax.experimental import pallas as pl
from jax.experimental.pallas import tpu as pltpu


def olfactor_kernel(x_ref, w_enc_ref, b_enc_ref, w_prd_ref, b_prd_ref,
                    embed_ref, logits_ref, *, tb, n, inv_n):
  """One grid step = TB graphs.

  x_ref      : (TB*N, F)  node features of TB graphs, flattened   (f32)
  w_enc_ref  : (F, E)     stand-in encoder node projection        (bf16)
  b_enc_ref  : (1, E)     encoder bias                            (f32)
  w_prd_ref  : (E, KP)    predict.weight^T, lane-padded to KP     (bf16)
  b_prd_ref  : (1, KP)    predict.bias, lane-padded               (f32)
  embed_ref  : (TB, E)    per-graph embeddings                    (f32)
  logits_ref : (TB, KP)   per-graph note logits (lane-padded)     (f32)
  """
  # ---- stand-in encoder: node Linear -> ReLU -> mean-pool readout ----
  # Cast x to bf16 on the VPU right before the MXU (f32 stays the HBM dtype).
  x = x_ref[...].astype(jnp.bfloat16)
  h = jnp.dot(x, w_enc_ref[...],
              preferred_element_type=jnp.float32)             # (TB*N, E) f32
  h = jnp.maximum(h + b_enc_ref[...], 0.0)

  e = h.shape[-1]
  # mean-pool = sum * (1/N); XLU sublane-reduce has slack at these sizes.
  # (If the epilogue ever binds, express pooling as an MXU matmul against a
  #  precomputed block-diagonal (TB, TB*N) pooling matrix scaled by 1/N.)
  emb = h.reshape(tb, n, e).sum(axis=1) * inv_n                # (TB, E) f32
  embed_ref[...] = emb.astype(embed_ref.dtype)

  # ---- predict head: logits = embed @ W^T + b (bf16 MXU, f32 accumulate) ----
  logits = jnp.dot(emb.astype(jnp.bfloat16), w_prd_ref[...],
                   preferred_element_type=jnp.float32) + b_prd_ref[...]
  logits_ref[...] = logits.astype(logits_ref.dtype)


def _choose_tb(batch, nodes, requested=None):
  """Pick graphs-per-step TB that divides B (no batch pad).

  Prefer >=2 blocks (v7x has 2 TensorCores) with >=512 node rows per step and
  a sublane-dense (multiple of 8) TB; otherwise fall back to one block over
  the whole batch (best for single-TC v5e/v6e at small B).
  """
  if requested is not None and batch % requested == 0:
    return requested
  divisors = [d for d in range(1, batch + 1) if batch % d == 0]
  good = [d for d in divisors
          if d * nodes >= 512 and batch // d >= 2 and d % 8 == 0]
  if good:
    return min(good)          # smallest TB meeting the bar -> most blocks
  return batch                # single block, never pads


@functools.partial(jax.jit, static_argnames=('tb',))
def olfactor_forward(x, w_enc, b_enc, w_prd, b_prd, *, tb=None):
  B, N, F = x.shape
  E = w_enc.shape[1]
  K = w_prd.shape[1]

  tb = _choose_tb(B, N, tb)
  num_blocks = B // tb

  # Lane-pad the predict head so the logits output block is 128-lane dense.
  KP = pl.cdiv(K, 128) * 128
  if KP != K:
    w_prd = jnp.pad(w_prd, ((0, 0), (0, KP - K)))
    b_prd = jnp.pad(b_prd, ((0, 0), (0, KP - K)))

  # Contiguous reshape only (free); the bf16 cast happens inside the kernel.
  x2d = x.reshape(B * N, F)
  w_enc_bf = w_enc.astype(jnp.bfloat16)
  w_prd_bf = w_prd.astype(jnp.bfloat16)

  # Explicit VMEM budget (double-buffered blocks + resident weights + outputs),
  # capped at v7x's 64 MiB physical VMEM per TensorCore.
  working_set = 2 * (tb * N * F * 4        # x block (f32)
                     + F * E * 2           # encoder weight (bf16)
                     + E * 4               # encoder bias (f32)
                     + E * KP * 2          # predict weight (bf16)
                     + KP * 4              # predict bias (f32)
                     + tb * E * 4          # embed block (f32)
                     + tb * KP * 4)        # logits block (f32)
  vmem_limit = int(min(max(4 * working_set, 8 << 20), 64 << 20))

  kernel = functools.partial(olfactor_kernel, tb=tb, n=N, inv_n=1.0 / N)

  embed, logits_p = pl.pallas_call(
      kernel,
      out_shape=(
          jax.ShapeDtypeStruct((B, E), jnp.float32),
          jax.ShapeDtypeStruct((B, KP), jnp.float32),
      ),
      grid_spec=pltpu.PrefetchScalarGridSpec(
          num_scalar_prefetch=0,
          grid=(num_blocks,),
          in_specs=[
              pl.BlockSpec((tb * N, F), lambda i: (i, 0)),   # TB graphs of nodes
              pl.BlockSpec((F, E), lambda i: (0, 0)),        # encoder weight (resident)
              pl.BlockSpec((1, E), lambda i: (0, 0)),        # encoder bias
              pl.BlockSpec((E, KP), lambda i: (0, 0)),       # predict weight^T
              pl.BlockSpec((1, KP), lambda i: (0, 0)),       # predict bias
          ],
          out_specs=[
              pl.BlockSpec((tb, E), lambda i: (i, 0)),
              pl.BlockSpec((tb, KP), lambda i: (i, 0)),
          ],
      ),
      compiler_params=pltpu.CompilerParams(
          dimension_semantics=("parallel",),
          vmem_limit_bytes=vmem_limit),
  )(x2d, w_enc_bf, b_enc, w_prd_bf, b_prd)

  return {'embed': embed, 'logits': logits_p[:, :K]}


def _linear_init(key, fan_in, fan_out):
  """Deterministic nn.Linear-style init: U(-1/sqrt(fan_in), 1/sqrt(fan_in))."""
  kw, kb = jax.random.split(key)
  bound = 1.0 / jnp.sqrt(jnp.float32(fan_in))
  w = jax.random.uniform(kw, (fan_in, fan_out), jnp.float32, -bound, bound)
  b = jax.random.uniform(kb, (1, fan_out), jnp.float32, -bound, bound)
  return w, b


def _reference(x, w_enc, b_enc, w_prd, b_prd):
  """Pure-JAX reference mirroring the kernel's intentional bf16 MXU rounding."""
  xb = x.astype(jnp.bfloat16)
  wb = w_enc.astype(jnp.bfloat16)
  h = jnp.einsum('bnf,fe->bne', xb, wb,
                 preferred_element_type=jnp.float32) + b_enc
  h = jnp.maximum(h, 0.0)
  emb = jnp.mean(h, axis=1)
  logits = jnp.dot(emb.astype(jnp.bfloat16), w_prd.astype(jnp.bfloat16),
                   preferred_element_type=jnp.float32) + b_prd
  return emb, logits


if __name__ == "__main__":
  # Small shapes consistent with the module:
  #   B graphs, N nodes per graph, F node features,
  #   embed_dim = encoder.readout.in_channels, notes_dim = prediction classes.
  # B*N = 1024 so the auto-chosen tiling gives 2 blocks of 512 node rows each
  # (both v7x TensorCores busy; >= the measured ~85%-roofline block size on a
  # single-TC chip). E is a multiple of 128 for lane-dense embed blocks.
  B, N, F = 64, 16, 32
  EMBED_DIM = 128
  NOTES_DIM = 8

  key = jax.random.PRNGKey(0)
  k_x, k_enc, k_prd = jax.random.split(key, 3)

  x = jax.random.normal(k_x, (B, N, F), jnp.float32)
  w_enc, b_enc = _linear_init(k_enc, F, EMBED_DIM)          # stand-in encoder
  w_prd, b_prd = _linear_init(k_prd, EMBED_DIM, NOTES_DIM)  # predict head

  out = olfactor_forward(x, w_enc, b_enc, w_prd, b_prd)
  jax.block_until_ready(out)

  # correctness check against a pure-JAX reference
  ref_embed, ref_logits = _reference(x, w_enc, b_enc, w_prd, b_prd)
  assert out['embed'].shape == (B, EMBED_DIM)
  assert out['logits'].shape == (B, NOTES_DIM)
  assert jnp.allclose(out['embed'], ref_embed, atol=2e-2, rtol=2e-2)
  assert jnp.allclose(out['logits'], ref_logits, atol=2e-2, rtol=2e-2)

  print("KERNEL_OK")
</pallas_src>

<mosaic_0001>
module attributes {stable_mosaic.version = 11 : i64} {
  func.func @olfactor_kernel(%arg0: i32, %arg1: memref<512x32xf32, #tpu.memory_space<vmem>>, %arg2: memref<32x128xbf16, #tpu.memory_space<vmem>>, %arg3: memref<1x128xf32, #tpu.memory_space<vmem>>, %arg4: memref<128x128xbf16, #tpu.memory_space<vmem>>, %arg5: memref<1x128xf32, #tpu.memory_space<vmem>>, %arg6: memref<32x128xf32, #tpu.memory_space<vmem>>, %arg7: memref<32x128xf32, #tpu.memory_space<vmem>>) attributes {dimension_semantics = [#tpu.dimension_semantics<parallel>], iteration_bounds = array<i64: 2>, scalar_prefetch = 0 : i64, scratch_operands = 0 : i64, tpu.core_type = #tpu.core_type<tc>, window_params = [{transform_indices = @transform_0, window_bounds = array<i64: 512, 32>}, {pipeline_mode = #tpu.pipeline_mode<synchronous>, transform_indices = @transform_1, window_bounds = array<i64: 32, 128>}, {pipeline_mode = #tpu.pipeline_mode<synchronous>, transform_indices = @transform_2, window_bounds = array<i64: 1, 128>}, {pipeline_mode = #tpu.pipeline_mode<synchronous>, transform_indices = @transform_3, window_bounds = array<i64: 128, 128>}, {pipeline_mode = #tpu.pipeline_mode<synchronous>, transform_indices = @transform_4, window_bounds = array<i64: 1, 128>}, {transform_indices = @transform_5, window_bounds = array<i64: 32, 128>}, {transform_indices = @transform_6, window_bounds = array<i64: 32, 128>}]} {
    %c0 = arith.constant 0 : index
    %c0_0 = arith.constant 0 : index
    %0 = vector.load %arg1[%c0, %c0_0] : memref<512x32xf32, #tpu.memory_space<vmem>>, vector<512x32xf32>
    %1 = arith.truncf %0 : vector<512x32xf32> to vector<512x32xbf16>
    %c0_1 = arith.constant 0 : index
    %c0_2 = arith.constant 0 : index
    %2 = vector.load %arg2[%c0_1, %c0_2] : memref<32x128xbf16, #tpu.memory_space<vmem>>, vector<32x128xbf16>
    %cst = arith.constant dense<0.000000e+00> : vector<512x128xf32>
    %3 = tpu.matmul %1, %2, %cst {dimension_numbers = #tpu.dot_dimension_numbers<[1], [0], [0], [1], [0, 0, 1, 1], [], []>} : vector<512x32xbf16>, vector<32x128xbf16>, vector<512x128xf32> -> vector<512x128xf32>
    %c0_3 = arith.constant 0 : index
    %c0_4 = arith.constant 0 : index
    %4 = vector.load %arg3[%c0_3, %c0_4] : memref<1x128xf32, #tpu.memory_space<vmem>>, vector<1x128xf32>
    %5 = vector.broadcast %4 : vector<1x128xf32> to vector<512x128xf32>
    %6 = arith.addf %3, %5 : vector<512x128xf32>
    %cst_5 = arith.constant 0.000000e+00 : f32
    %7 = vector.broadcast %cst_5 : f32 to vector<512x128xf32>
    %8 = arith.maximumf %6, %7 : vector<512x128xf32>
    %9 = vector.shape_cast %8 : vector<512x128xf32> to vector<32x16x128xf32>
    %cst_6 = arith.constant dense<0.000000e+00> : vector<32x128xf32>
    %10 = vector.multi_reduction <add>, %9, %cst_6 [1] : vector<32x16x128xf32> to vector<32x128xf32>
    %cst_7 = arith.constant 6.250000e-02 : f32
    %11 = vector.broadcast %cst_7 : f32 to vector<32x128xf32>
    %12 = arith.mulf %10, %11 : vector<32x128xf32>
    %c0_8 = arith.constant 0 : index
    %c0_9 = arith.constant 0 : index
    %13 = vector.load %arg6[%c0_8, %c0_9] : memref<32x128xf32, #tpu.memory_space<vmem>>, vector<32x128xf32>
    tpu.vector_store %arg6[%c0_8, %c0_9], %12 {strides = array<i32>} : memref<32x128xf32, #tpu.memory_space<vmem>>, vector<32x128xf32>,
    %14 = arith.truncf %12 : vector<32x128xf32> to vector<32x128xbf16>
    %c0_10 = arith.constant 0 : index
    %c0_11 = arith.constant 0 : index
    %15 = vector.load %arg4[%c0_10, %c0_11] : memref<128x128xbf16, #tpu.memory_space<vmem>>, vector<128x128xbf16>
    %cst_12 = arith.constant dense<0.000000e+00> : vector<32x128xf32>
    %16 = tpu.matmul %14, %15, %cst_12 {dimension_numbers = #tpu.dot_dimension_numbers<[1], [0], [0], [1], [0, 0, 1, 1], [], []>} : vector<32x128xbf16>, vector<128x128xbf16>, vector<32x128xf32> -> vector<32x128xf32>
    %c0_13 = arith.constant 0 : index
    %c0_14 = arith.constant 0 : index
    %17 = vector.load %arg5[%c0_13, %c0_14] : memref<1x128xf32, #tpu.memory_space<vmem>>, vector<1x128xf32>
    %18 = vector.broadcast %17 : vector<1x128xf32> to vector<32x128xf32>
    %19 = arith.addf %16, %18 : vector<32x128xf32>
    %c0_15 = arith.constant 0 : index
    %c0_16 = arith.constant 0 : index
    %20 = vector.load %arg7[%c0_15, %c0_16] : memref<32x128xf32, #tpu.memory_space<vmem>>, vector<32x128xf32>
    tpu.vector_store %arg7[%c0_15, %c0_16], %19 {strides = array<i32>} : memref<32x128xf32, #tpu.memory_space<vmem>>, vector<32x128xf32>,
    return
  }
  func.func @transform_0(%arg0: i32) -> (i32, i32) {
    %c0_i32 = arith.constant 0 : i32
    %c0_i32_0 = arith.constant 0 : i32
    return %arg0, %c0_i32 : i32, i32
  }
  func.func @transform_1(%arg0: i32) -> (i32, i32) {
    %c0_i32 = arith.constant 0 : i32
    %c0_i32_0 = arith.constant 0 : i32
    %c0_i32_1 = arith.constant 0 : i32
    return %c0_i32, %c0_i32_0 : i32, i32
  }
  func.func @transform_2(%arg0: i32) -> (i32, i32) {
    %c0_i32 = arith.constant 0 : i32
    %c0_i32_0 = arith.constant 0 : i32
    %c0_i32_1 = arith.constant 0 : i32
    return %c0_i32, %c0_i32_0 : i32, i32
  }
  func.func @transform_3(%arg0: i32) -> (i32, i32) {
    %c0_i32 = arith.constant 0 : i32
    %c0_i32_0 = arith.constant 0 : i32
    %c0_i32_1 = arith.constant 0 : i32
    return %c0_i32, %c0_i32_0 : i32, i32
  }
  func.func @transform_4(%arg0: i32) -> (i32, i32) {
    %c0_i32 = arith.constant 0 : i32
    %c0_i32_0 = arith.constant 0 : i32
    %c0_i32_1 = arith.constant 0 : i32
    return %c0_i32, %c0_i32_0 : i32, i32
  }
  func.func @transform_5(%arg0: i32) -> (i32, i32) {
    %c0_i32 = arith.constant 0 : i32
    %c0_i32_0 = arith.constant 0 : i32
    return %arg0, %c0_i32 : i32, i32
  }
  func.func @transform_6(%arg0: i32) -> (i32, i32) {
    %c0_i32 = arith.constant 0 : i32
    %c0_i32_0 = arith.constant 0 : i32
    return %arg0, %c0_i32 : i32, i32
  }
}

</mosaic_0001>

<bundles_post_ra>
// kernel: olfactor_forward.1
= control target key start
LH: loop header
LB: loop body
LE: loop exit
PB: predicated region body
PF: predicated region fallthrough
CT: control target
= control target key end

     0   :  { %12 = vsyncpa [#allocation3], 0  ;;  %s2147_s0 = inlined_call_operand.vmem [shape: f32[1024,32], index: 0, kind: input, shape index: {}]   ;;  %s2148_s1 = inlined_call_operand.vmem [shape: bf16[32,128], index: 1, kind: input, shape index: {}]   ;;  %s2149_s2 = inlined_call_operand.vmem [shape: f32[1,128], index: 2, kind: input, shape index: {}]   ;;  %s2150_s3 = inlined_call_operand.vmem [shape: bf16[128,128], index: 3, kind: input, shape index: {}]   ;;  %s2151_s4 = inlined_call_operand.vmem [shape: f32[1,128], index: 4, kind: input, shape index: {}]   ;;  %s2152_s5 = inlined_call_operand.hbm [shape: f32[64,128], index: 5, kind: output, shape index: {0}]   ;;  %s2153_s6 = inlined_call_operand.vmem [shape: f32[64,128], index: 6, kind: output, shape index: {1}]  }
   0x1   :  { %14 = vsyncpa [#allocation3 + $0x1], 0  ;;  %s1623_s21 = smov 0   ;;  %s1625_s22 = smov 0  }
   0x2   :  { %s1627_s23 = smov 0   ;;  %s1629_s24 = smov 0  }
   0x3 LB: > { %s1644_s25 = sadd.s32 4294967295, %s1584_s24   ;;  %s1376_s26 = sadd.s32 4294967294, %s1584_s24   ;;  %s1584_s24 = sphi %s1629_s24, %s2159_s24   ;;  %s1580_s23 = sphi %s1627_s23, %s2158_s23   ;;  %s1576_s22 = sphi %s1625_s22, %s2157_s22   ;;  %s1572_s21 = sphi %s1623_s21, %s2156_s21  }
   0x4   : > { %s1648_s27 = sadd.s32 1, %s1584_s24   ;;  %s137_s28 = sadd.s32 1, %s1580_s23 }
   0x5   : > { %s134_s29 = ssub.s32 %s1584_s24, %s1648_s27  ;;  %p147_p0 = scmp.ne.s32.totalorder %s1580_s23, %s1576_s22 }
   0x6   : > { %p135_p1 = scmp.eq.s32.totalorder %s134_s29, 0  ;;  %p148_p2 = scmp.eq.s32.totalorder %s1644_s25, 1 }
   0x7   : > { %p153_p3 = scmp.ne.s32.totalorder %s1576_s22, %s1572_s21  ;;  %p154_p4 = scmp.eq.s32.totalorder %s1376_s26, 1 }
   0x8   : > { %s1659_s30 = scalar_select %p135_p1, %s1580_s23, %s137_s28  }
   0x9   : > { %p1661_p5 = por %p148_p2, %p147_p0  ;;  %p1665_p6 = por %p154_p4, %p153_p3 }
   0xa   : > { %p1379_p7 = scmp.ge.s32.totalorder %s1584_s24, 1  ;;  %p219_p8 = scmp.lt.s32.totalorder %s1584_s24, 3 }
   0xc   : > { %p220_p9 = pnand %p1379_p7, %p219_p8 }
   0xd   : > { %s1381_s11 = sshll.u32 (!%p220_p9), %s1644_s25, 6  ;;  %s244_s19 = sand.u32 (!%p220_p9), 1, %s1576_s22  }
   0xe   : > { %223 = sbr.rel (%p220_p9) target bundleno = 475 (0x1db), region = 40  ;;  %p255_p10 = scmp.lt.s32.totalorder (!%p220_p9), %s1381_s11, 127 }
   0xf   : > { %s1380_s28 = sshll.u32 (!%p220_p9), %s244_s19, 5  ;;  %s1472_s9 = sshll.u32 (!%p220_p9), %s1644_s25, 5 }
  0x10   : > { %s2034_s29 = scalar_lea.vmem (!%p220_p9), [#allocation2], %s1380_s28  ;;  %s1281_s12 = scalar_lea.hbm (!%p220_p9), %s2152_s5, %s1472_s9 }
  0x11   : > { %s1282_s13 = sshll.u32 (!%p220_p9), %s2034_s29, 4  ;;  %s1265_s15 = scalar_lea.sflag (!%p220_p9), [#allocation3], %s244_s19  ;;  %s1283_s13 = int_to_ptr.vmem [resolvable:$true] %s1282_s13 }
  0x12   : > { %s1542_s26 = scalar_lea.hbm (!%p220_p9), %s2152_s5, 64 }
  0x13   : > { %v1463_v0 = vld [vmem:[%s2148_s1 + $0x8] sm:$0xff]  ;;  %v1462_v1 = vld [vmem:[%s2148_s1] sm:$0xff]  ;;  %s2161_s11 = smov (!%p255_p10, %s1381_s11), 127  ;;  %vm384_vm0 = vcmask 261120   ;;  %vm1002_vm1 = vcmask 1041409   ;;  %vm1004_vm2 = vcmask 1042434  }
  0x14   : > { %487 = vmatpush.bf16.msra.mxu0 %v1463_v0  ;;  %1474 = vmatpush.bf16.msra.mxu2 %v1463_v0  ;;  %s1382_s14 = sshll.u32 %s2161_s11, 3  ;;  %vm1006_vm3 = vcmask 1043459   ;;  %vm1008_vm4 = vcmask 1044484   ;;  %vm1010_vm5 = vcmask 1045509   ;;  %vm1012_vm6 = vcmask 1046534  }
  0x15   : > { %1475 = vmatpush.bf16.msra.mxu3 %v1463_v0  ;;  %1473 = vmatpush.bf16.msra.mxu1 %v1463_v0  ;;  %s1681_s17 = scalar_lea.vmem %s2147_s0, %s1382_s14  ;;  %vm1014_vm7 = vcmask 1047559   ;;  %s1284_s14 = sshll.u32 %s1281_s12, 4  ;;  %s1285_s14 = int_to_ptr.hbm [resolvable:$true] %s1284_s14 }
  0x16   : > { %v268_v2 = vld [vmem:[%s1681_s17] sm:$0xff]  ;;  %v269_v3 = vld [vmem:[%s1681_s17 + $0x8] sm:$0xff]  ;;  %v314_v7 = vld [vmem:[%s1681_s17 + $0x170] sm:$0xff]  ;;  %s1536_s16 = sshra.s32 %s1285_s14, 4  ;;  %s1537_s16 = int_to_ptr.hbm [resolvable:$true] %s1536_s16 }
  0x17   : > { %v296_v4 = vld [vmem:[%s1681_s17 + $0xe0] sm:$0xff]  ;;  %v332_v5 = vpack.c.bf16 %v269_v3, %v268_v2  ;;  %v297_v6 = vld [vmem:[%s1681_s17 + $0xe8] sm:$0xff]  ;;  %v315_v8 = vld [vmem:[%s1681_s17 + $0x178] sm:$0xff]  ;;  %p1543_p0 = scmp.lt.s32.totalorder %s1537_s16, %s2152_s5 }
  0x18   : > { %488 = vmatpush.bf16.msra.mxu0 %v1462_v1  ;;  %1477 = vmatpush.bf16.msra.mxu2 %v1462_v1  ;;  %v346_v9 = vpack.c.bf16 %v297_v6, %v296_v4  ;;  %v355_v10 = vpack.c.bf16 %v315_v8, %v314_v7  ;;  %v270_v11 = vld [vmem:[%s1681_s17 + $0x10] sm:$0xff]  ;;  %v271_v12 = vld [vmem:[%s1681_s17 + $0x18] sm:$0xff]  ;;  %v316_v15 = vld [vmem:[%s1681_s17 + $0x180] sm:$0xff] }
  0x19   : > { %1478 = vmatpush.bf16.msra.mxu3 %v1462_v1  ;;  %1476 = vmatpush.bf16.msra.mxu1 %v1462_v1  ;;  %v298_v13 = vld [vmem:[%s1681_s17 + $0xf0] sm:$0xff]  ;;  %v299_v14 = vld [vmem:[%s1681_s17 + $0xf8] sm:$0xff]  ;;  %v317_v16 = vld [vmem:[%s1681_s17 + $0x188] sm:$0xff]  ;;  %v333_v17 = vpack.c.bf16 %v271_v12, %v270_v11 }
  0x1a   : > { %v347_v18 = vpack.c.bf16 %v299_v14, %v298_v13  ;;  %v356_v19 = vpack.c.bf16 %v317_v16, %v316_v15  ;;  %v286_v20 = vld [vmem:[%s1681_s17 + $0x90] sm:$0xff]  ;;  %v287_v21 = vld [vmem:[%s1681_s17 + $0x98] sm:$0xff]  ;;  %v272_v23 = vld [vmem:[%s1681_s17 + $0x20] sm:$0xff] }
  0x1b   : > { %1393 = vmatmul.msk.bf16.vlgmr.msra.gmra.mxu0 %vm384_vm0, %v332_v5  ;;  %1407 = vmatmul.msk.bf16.vlgmr.msra.gmra.mxu2 %vm384_vm0, %v346_v9  ;;  %v341_v22 = vpack.c.bf16 %v287_v21, %v286_v20  ;;  %v273_v24 = vld [vmem:[%s1681_s17 + $0x28] sm:$0xff]  ;;  %v300_v25 = vld [vmem:[%s1681_s17 + $0x100] sm:$0xff]  ;;  %v318_v27 = vld [vmem:[%s1681_s17 + $0x190] sm:$0xff] }
  0x1c   : > { %1416 = vmatmul.msk.bf16.vlgmr.msra.gmra.mxu3 %vm384_vm0, %v355_v10  ;;  %v301_v26 = vld [vmem:[%s1681_s17 + $0x108] sm:$0xff]  ;;  %v319_v28 = vld [vmem:[%s1681_s17 + $0x198] sm:$0xff]  ;;  %v334_v29 = vpack.c.bf16 %v273_v24, %v272_v23  ;;  %v288_v32 = vld [vmem:[%s1681_s17 + $0xa0] sm:$0xff] }
  0x1d   : > { %1402 = vmatmul.msk.bf16.vlgmr.msra.gmra.mxu1 %vm384_vm0, %v341_v22  ;;  %v348_v30 = vpack.c.bf16 %v301_v26, %v300_v25  ;;  %v357_v31 = vpack.c.bf16 %v319_v28, %v318_v27  ;;  %v289_v33 = vld [vmem:[%s1681_s17 + $0xa8] sm:$0xff]  ;;  %v274_v35 = vld [vmem:[%s1681_s17 + $0x30] sm:$0xff]  ;;  %v275_v36 = vld [vmem:[%s1681_s17 + $0x38] sm:$0xff] }
  0x1e   : > { %v342_v34 = vpack.c.bf16 %v289_v33, %v288_v32  ;;  %v302_v37 = vld [vmem:[%s1681_s17 + $0x110] sm:$0xff]  ;;  %v303_v38 = vld [vmem:[%s1681_s17 + $0x118] sm:$0xff]  ;;  %v320_v39 = vld [vmem:[%s1681_s17 + $0x1a0] sm:$0xff]  ;;  %v335_v41 = vpack.c.bf16 %v275_v36, %v274_v35 }
  0x1f   : > { %v321_v40 = vld [vmem:[%s1681_s17 + $0x1a8] sm:$0xff]  ;;  %v349_v42 = vpack.c.bf16 %v303_v38, %v302_v37  ;;  %v290_v44 = vld [vmem:[%s1681_s17 + $0xb0] sm:$0xff]  ;;  %v291_v45 = vld [vmem:[%s1681_s17 + $0xb8] sm:$0xff] }
  0x20   : > { %v358_v43 = vpack.c.bf16 %v321_v40, %v320_v39  ;;  %v343_v46 = vpack.c.bf16 %v291_v45, %v290_v44  ;;  %v276_v47 = vld [vmem:[%s1681_s17 + $0x40] sm:$0xff]  ;;  %v277_v48 = vld [vmem:[%s1681_s17 + $0x48] sm:$0xff]  ;;  %v322_v51 = vld [vmem:[%s1681_s17 + $0x1b0] sm:$0xff] }
  0x21   : > { %v304_v49 = vld [vmem:[%s1681_s17 + $0x120] sm:$0xff]  ;;  %v305_v50 = vld [vmem:[%s1681_s17 + $0x128] sm:$0xff]  ;;  %v323_v52 = vld [vmem:[%s1681_s17 + $0x1b8] sm:$0xff]  ;;  %v336_v53 = vpack.c.bf16 %v277_v48, %v276_v47 }
  0x22   : > { %v350_v54 = vpack.c.bf16 %v305_v50, %v304_v49  ;;  %v359_v55 = vpack.c.bf16 %v323_v52, %v322_v51  ;;  %v292_v56 = vld [vmem:[%s1681_s17 + $0xc0] sm:$0xff]  ;;  %v293_v57 = vld [vmem:[%s1681_s17 + $0xc8] sm:$0xff]  ;;  %v278_v59 = vld [vmem:[%s1681_s17 + $0x50] sm:$0xff] }
  0x23   : > { %v344_v58 = vpack.c.bf16 %v293_v57, %v292_v56  ;;  %v279_v60 = vld [vmem:[%s1681_s17 + $0x58] sm:$0xff]  ;;  %v306_v61 = vld [vmem:[%s1681_s17 + $0x130] sm:$0xff]  ;;  %v324_v63 = vld [vmem:[%s1681_s17 + $0x1c0] sm:$0xff] }
  0x24   : > { %v307_v62 = vld [vmem:[%s1681_s17 + $0x138] sm:$0xff]  ;;  %v325_v0 = vld [vmem:[%s1681_s17 + $0x1c8] sm:$0xff]  ;;  %v337_v1 = vpack.c.bf16 %v279_v60, %v278_v59  ;;  %v294_v4 = vld [vmem:[%s1681_s17 + $0xd0] sm:$0xff] }
  0x25   : > { %v351_v2 = vpack.c.bf16 %v307_v62, %v306_v61  ;;  %v360_v3 = vpack.c.bf16 %v325_v0, %v324_v63  ;;  %v295_v5 = vld [vmem:[%s1681_s17 + $0xd8] sm:$0xff]  ;;  %v280_v7 = vld [vmem:[%s1681_s17 + $0x60] sm:$0xff]  ;;  %v281_v8 = vld [vmem:[%s1681_s17 + $0x68] sm:$0xff] }
  0x26   : > { %v345_v6 = vpack.c.bf16 %v295_v5, %v294_v4  ;;  %v308_v9 = vld [vmem:[%s1681_s17 + $0x140] sm:$0xff]  ;;  %v309_v10 = vld [vmem:[%s1681_s17 + $0x148] sm:$0xff]  ;;  %v326_v11 = vld [vmem:[%s1681_s17 + $0x1d0] sm:$0xff]  ;;  %v338_v13 = vpack.c.bf16 %v281_v8, %v280_v7 }
  0x27   : > { %v327_v12 = vld [vmem:[%s1681_s17 + $0x1d8] sm:$0xff]  ;;  %v352_v14 = vpack.c.bf16 %v309_v10, %v308_v9  ;;  %v282_v16 = vld [vmem:[%s1681_s17 + $0x70] sm:$0xff]  ;;  %v328_v20 = vld [vmem:[%s1681_s17 + $0x1e0] sm:$0xff] }
  0x28   : > { %v361_v15 = vpack.c.bf16 %v327_v12, %v326_v11  ;;  %v329_v21 = vld [vmem:[%s1681_s17 + $0x1e8] sm:$0xff]  ;;  %v284_v25 = vld [vmem:[%s1681_s17 + $0x80] sm:$0xff] }
  0x29   : > { %v362_v24 = vpack.c.bf16 %v329_v21, %v328_v20  ;;  %v285_v26 = vld [vmem:[%s1681_s17 + $0x88] sm:$0xff]  ;;  %v312_v27 = vld [vmem:[%s1681_s17 + $0x160] sm:$0xff] }
  0x2a   : > { %v313_v28 = vld [vmem:[%s1681_s17 + $0x168] sm:$0xff]  ;;  %v1779_v35 = vld [vmem:[%s2149_s2] ss:$0 sm:$0xff] }
  0x2b   : > { %1394 = vmatmul.msk.bf16.gmra.mxu0 %vm384_vm0, %v333_v17  ;;  %1408 = vmatmul.msk.bf16.gmra.mxu2 %vm384_vm0, %v347_v18  ;;  %v283_v17 = vld [vmem:[%s1681_s17 + $0x78] sm:$0xff]  ;;  %v310_v18 = vld [vmem:[%s1681_s17 + $0x150] sm:$0xff]  ;;  %v354_v33 = vpack.c.bf16 %v313_v28, %v312_v27 }
  0x2c   : > { %1417 = vmatmul.msk.bf16.gmra.mxu3 %vm384_vm0, %v356_v19  ;;  %v311_v19 = vld [vmem:[%s1681_s17 + $0x158] sm:$0xff]  ;;  %v339_v22 = vpack.c.bf16 %v283_v17, %v282_v16 }
  0x2d   : > { %1403 = vmatmul.msk.bf16.gmra.mxu1 %vm384_vm0, %v342_v34  ;;  %v353_v23 = vpack.c.bf16 %v311_v19, %v310_v18 }
  0x3b   : > { %1395 = vmatmul.msk.bf16.gmra.mxu0 %vm384_vm0, %v334_v29  ;;  %1409 = vmatmul.msk.bf16.gmra.mxu2 %vm384_vm0, %v348_v30  ;;  %v330_v29 = vld [vmem:[%s1681_s17 + $0x1f0] sm:$0xff]  ;;  %v331_v30 = vld [vmem:[%s1681_s17 + $0x1f8] sm:$0xff]  ;;  %s1538_s17 = scalar_lea.hbm %s1537_s16, 32 }
  0x3c   : > { %1418 = vmatmul.msk.bf16.gmra.mxu3 %vm384_vm0, %v357_v31  ;;  %v340_v31 = vpack.c.bf16 %v285_v26, %v284_v25  ;;  %v363_v34 = vpack.c.bf16 %v331_v30, %v330_v29  ;;  %p1539_p11 = scmp.ne.s32.totalorder %s1537_s16, %s1538_s17  ;;  %p1544_p1 = scmp.lt.s32.totalorder %s1542_s26, %s1538_s17 }
  0x3d   : > { %1404 = vmatmul.msk.bf16.gmra.mxu1 %vm384_vm0, %v343_v46 }
  0x3e   : > { %p1540_p12 = pnand %p1539_p11, %p1661_p5  ;;  %p1545_p2 = por %p1544_p1, %p1543_p0 }
  0x40   : > { %p1541_p13 = pneg %p1540_p12 }
  0x42   : > { %p1546_p3 = pnand %p1545_p2, %p1541_p13 }
  0x4b   : > { %1396 = vmatmul.msk.bf16.gmra.mxu0 %vm384_vm0, %v335_v41  ;;  %1410 = vmatmul.msk.bf16.gmra.mxu2 %vm384_vm0, %v349_v42 }
  0x4c   : > { %1419 = vmatmul.msk.bf16.gmra.mxu3 %vm384_vm0, %v358_v43 }
  0x4d   : > { %1405 = vmatmul.msk.bf16.gmra.mxu1 %vm384_vm0, %v344_v58 }
  0x5b   : > { %1397 = vmatmul.msk.bf16.gmra.mxu0 %vm384_vm0, %v336_v53  ;;  %1411 = vmatmul.msk.bf16.gmra.mxu2 %vm384_vm0, %v350_v54 }
  0x5c   : > { %1420 = vmatmul.msk.bf16.gmra.mxu3 %vm384_vm0, %v359_v55 }
  0x5d   : > { %1406 = vmatmul.msk.bf16.gmra.mxu1 %vm384_vm0, %v345_v6 }
  0x6b   : > { %1398 = vmatmul.msk.bf16.gmra.mxu0 %vm384_vm0, %v337_v1  ;;  %1412 = vmatmul.msk.bf16.gmra.mxu2 %vm384_vm0, %v351_v2 }
  0x6c   : > { %1421 = vmatmul.msk.bf16.gmra.mxu3 %vm384_vm0, %v360_v3 }
  0x7b   : > { %1399 = vmatmul.msk.bf16.gmra.mxu0 %vm384_vm0, %v338_v13  ;;  %1413 = vmatmul.msk.bf16.gmra.mxu2 %vm384_vm0, %v352_v14 }
  0x7c   : > { %1422 = vmatmul.msk.bf16.gmra.mxu3 %vm384_vm0, %v361_v15 }
  0x8b   : > { %1400 = vmatmul.msk.bf16.gmra.mxu0 %vm384_vm0, %v339_v22  ;;  %1414 = vmatmul.msk.bf16.gmra.mxu2 %vm384_vm0, %v353_v23 }
  0x8c   : > { %1423 = vmatmul.msk.bf16.gmra.mxu3 %vm384_vm0, %v362_v24 }
  0x98   : > { %v490_v32 = vpop.f32.mrf.mxu0 }
  0x99   : > { %v491_v36 = vadd.f32 %v1779_v35, %v490_v32 }
  0x9a   : > { %v1795_v0 = vpop.f32.mrf.mxu1 }
  0x9b   : > { %1401 = vmatmul.msk.bf16.gmra.mxu0 %vm384_vm0, %v340_v31  ;;  %1415 = vmatmul.msk.bf16.gmra.mxu2 %vm384_vm0, %v354_v33  ;;  %v650_v41 = vmax.f32 %v491_v36, 0.0 }
  0x9c   : > { %1424 = vmatmul.msk.bf16.gmra.mxu3 %vm384_vm0, %v363_v34 }
  0x9e   : > { %v560_v37 = vpop.f32.mrf.mxu2 }
  0x9f   : > { %v605_v38 = vpop.f32.mrf.mxu3  ;;  %v561_v43 = vadd.f32 %v1779_v35, %v560_v37 }
  0xa0   : > { %v492_v39 = vpop.f32.mrf.mxu0  ;;  %v606_v44 = vadd.f32 %v1779_v35, %v605_v38 }
  0xa1   : > { %v493_v40 = vadd.f32 %v1779_v35, %v492_v39  ;;  %v678_v49 = vmax.f32 %v561_v43, 0.0 }
  0xa2   : > { %v696_v50 = vmax.f32 %v606_v44, 0.0  ;;  %v1802_v17 = vpop.f32.mrf.mxu1 }
  0xa3   : > { %v651_v42 = vmax.f32 %v493_v40, 0.0 }
  0xa5   : > { %v714_v45 = vadd.f32 %v651_v42, %v650_v41 }
  0xa6   : > { %v562_v47 = vpop.f32.mrf.mxu2 }
  0xa7   : > { %v715_v46 = vrot.slane %v714_v45, 4  ;;  %v607_v48 = vpop.f32.mrf.mxu3  ;;  %v563_v51 = vadd.f32 %v1779_v35, %v562_v47 }
  0xa8   : > { %v608_v52 = vadd.f32 %v1779_v35, %v607_v48  ;;  %v495_v53 = vpop.f32.mrf.mxu0 }
  0xa9   : > { %v716_v54 = vadd.f32 %v715_v46, %v714_v45  ;;  %v679_v55 = vmax.f32 %v563_v51, 0.0  ;;  %v496_v60 = vadd.f32 %v1779_v35, %v495_v53 }
  0xaa   : > { %v697_v56 = vmax.f32 %v608_v52, 0.0  ;;  %v1807_v34 = vpop.f32.mrf.mxu1 }
  0xab   : > { %v1790_v57 = vadd.f32 %v679_v55, %v678_v49  ;;  %v717_v59 = vrot.slane %v716_v54, 2  ;;  %v652_v3 = vmax.f32 %v496_v60, 0.0 }
  0xac   : > { %v1792_v58 = vadd.f32 %v697_v56, %v696_v50 }
  0xad   : > { %v718_v2 = vadd.f32 %v717_v59, %v716_v54 }
  0xae   : > { %v565_v61 = vpop.f32.mrf.mxu2 }
  0xaf   : > { %v610_v62 = vpop.f32.mrf.mxu3  ;;  %v566_v5 = vadd.f32 %v1779_v35, %v565_v61  ;;  %v719_v8 = vrot.slane %v718_v2, 1 }
  0xb0   : > { %v497_v63 = vpop.f32.mrf.mxu0  ;;  %v611_v6 = vadd.f32 %v1779_v35, %v610_v62 }
  0xb1   : > { %v498_v1 = vadd.f32 %v1779_v35, %v497_v63  ;;  %v680_v12 = vmax.f32 %v566_v5, 0.0  ;;  %v720_v19 = vadd.f32 %v719_v8, %v718_v2 }
  0xb2   : > { %v698_v13 = vmax.f32 %v611_v6, 0.0  ;;  %v1815_v61 = vpop.f32.mrf.mxu1 }
  0xb3   : > { %v653_v4 = vmax.f32 %v498_v1, 0.0  ;;  %v938_v26 = vmul.f32 0.0625, %v720_v19 }
  0xb5   : > { %v721_v7 = vadd.f32 %v653_v4, %v652_v3  ;;  %v1045_v38 = vpack.c.bf16 %v938_v26, %v938_v26 }
  0xb6   : > { %v567_v10 = vpop.f32.mrf.mxu2 }
  0xb7   : > { %v722_v9 = vrot.slane %v721_v7, 4  ;;  %v612_v11 = vpop.f32.mrf.mxu3  ;;  %v568_v14 = vadd.f32 %v1779_v35, %v567_v10  ;;  %v1129_v48 = vunpack.c.l.b16 %v1045_v38  ;;  %v876_v38 = vrot.slane %v1792_v58, 4 }
  0xb8   : > { %v613_v15 = vadd.f32 %v1779_v35, %v612_v11  ;;  %v500_v16 = vpop.f32.mrf.mxu0 }
  0xb9   : > { %v723_v18 = vadd.f32 %v722_v9, %v721_v7  ;;  %v681_v20 = vmax.f32 %v568_v14, 0.0  ;;  %v501_v29 = vadd.f32 %v1779_v35, %v500_v16 }
  0xba   : > { %v699_v21 = vmax.f32 %v613_v15, 0.0  ;;  %v1821_v16 = vpop.f32.mrf.mxu1 }
  0xbb   : > { %v724_v22 = vrot.slane %v723_v18, 2  ;;  %v1804_v23 = vadd.f32 %v681_v20, %v680_v12  ;;  %v654_v40 = vmax.f32 %v501_v29, 0.0 }
  0xbc   : > { %v882_v24 = vadd.f32 %v699_v21, %v698_v13 }
  0xbd   : > { %v725_v25 = vadd.f32 %v724_v22, %v723_v18 }
  0xbe   : > { %v883_v27 = vrot.slane %v882_v24, 4  ;;  %v570_v30 = vpop.f32.mrf.mxu2 }
  0xbf   : > { %v726_v28 = vrot.slane %v725_v25, 1  ;;  %v615_v31 = vpop.f32.mrf.mxu3  ;;  %v571_v41 = vadd.f32 %v1779_v35, %v570_v30 }
  0xc0   : > { %v884_v32 = vadd.f32 %v883_v27, %v882_v24  ;;  %v502_v33 = vpop.f32.mrf.mxu0  ;;  %v616_v44 = vadd.f32 %v1779_v35, %v615_v31 }
  0xc1   : > { %v727_v36 = vadd.f32 %v726_v28, %v725_v25  ;;  %v503_v37 = vadd.f32 %v1779_v35, %v502_v33  ;;  %v682_v50 = vmax.f32 %v571_v41, 0.0 }
  0xc2   : > { %v885_v43 = vrot.slane %v884_v32, 2  ;;  %v700_v55 = vmax.f32 %v616_v44, 0.0 }
  0xc3   : > { %v939_v39 = vmul.f32 0.0625, %v727_v36  ;;  %v655_v42 = vmax.f32 %v503_v37, 0.0  ;;  %v813_v37 = vrot.slane %v1790_v57, 4 }
  0xc4   : > { %v886_v54 = vadd.f32 %v885_v43, %v884_v32 }
  0xc5   : > { %v1003_v45 = vsel %vm1002_vm1, %v939_v39, %v938_v26  ;;  %v1046_v46 = vpack.c.bf16 %v939_v39, %v939_v39  ;;  %v728_v47 = vadd.f32 %v655_v42, %v654_v40 }
  0xc6   : > { %v572_v52 = vpop.f32.mrf.mxu2  ;;  %v887_v4 = vrot.slane %v886_v54, 1 }
  0xc7   : > { %v1130_v49 = vunpack.c.l.b16 %v1046_v46  ;;  %v729_v51 = vrot.slane %v728_v47, 4  ;;  %v617_v53 = vpop.f32.mrf.mxu3  ;;  %v573_v56 = vadd.f32 %v1779_v35, %v572_v52 }
  0xc8   : > { %v618_v59 = vadd.f32 %v1779_v35, %v617_v53  ;;  %v505_v60 = vpop.f32.mrf.mxu0  ;;  %v888_v13 = vadd.f32 %v887_v4, %v886_v54  ;;  %v536_v4 = vadd.f32 %v1779_v35, %v1795_v0 }
  0xc9   : > { %v1818_v62 = vsel %vm1002_vm1, %v1130_v49, %v1129_v48  ;;  %v730_v63 = vadd.f32 %v729_v51, %v728_v47  ;;  %v683_v1 = vmax.f32 %v573_v56, 0.0  ;;  %v506_v10 = vadd.f32 %v1779_v35, %v505_v60 }
  0xca   : > { %v701_v2 = vmax.f32 %v618_v59, 0.0  ;;  %v962_v26 = vmul.f32 0.0625, %v888_v13  ;;  %v814_v56 = vadd.f32 %v813_v37, %v1790_v57  ;;  %v877_v60 = vadd.f32 %v876_v38, %v1792_v58 }
  0xcb   : > { %v731_v3 = vrot.slane %v730_v63, 2  ;;  %v826_v5 = vadd.f32 %v683_v1, %v682_v50  ;;  %v656_v24 = vmax.f32 %v506_v10, 0.0  ;;  %v538_v58 = vadd.f32 %v1779_v35, %v1802_v17 }
  0xcc   : > { %v889_v6 = vadd.f32 %v701_v2, %v700_v55  ;;  %v1069_v47 = vpack.c.bf16 %v962_v26, %v962_v26  ;;  %v1835_v55 = vpop.f32.mrf.mxu1  ;;  %v543_v37 = vadd.f32 %v1779_v35, %v1815_v61 }
  0xcd   : > { %v732_v7 = vadd.f32 %v731_v3, %v730_v63  ;;  %v827_v19 = vrot.slane %v826_v5, 4 }
  0xce   : > { %v890_v8 = vrot.slane %v889_v6, 4  ;;  %v575_v11 = vpop.f32.mrf.mxu2  ;;  %v1153_v3 = vunpack.c.l.b16 %v1069_v47 }
  0xcf   : > { %v733_v9 = vrot.slane %v732_v7, 1  ;;  %v620_v12 = vpop.f32.mrf.mxu3  ;;  %v576_v28 = vadd.f32 %v1779_v35, %v575_v11  ;;  %v828_v30 = vadd.f32 %v827_v19, %v826_v5  ;;  %v878_v19 = vrot.slane %v877_v60, 2 }
  0xd0   : > { %v891_v14 = vadd.f32 %v890_v8, %v889_v6  ;;  %v507_v15 = vpop.f32.mrf.mxu0  ;;  %v621_v31 = vadd.f32 %v1779_v35, %v620_v12 }
  0xd1   : > { %v734_v18 = vadd.f32 %v733_v9, %v732_v7  ;;  %v508_v20 = vadd.f32 %v1779_v35, %v507_v15  ;;  %v684_v43 = vmax.f32 %v576_v28, 0.0  ;;  %v829_v48 = vrot.slane %v828_v30, 2 }
  0xd2   : > { %v892_v21 = vrot.slane %v891_v14, 2  ;;  %v702_v49 = vmax.f32 %v621_v31, 0.0 }
  0xd3   : > { %v940_v22 = vmul.f32 0.0625, %v734_v18  ;;  %v657_v25 = vmax.f32 %v508_v20, 0.0  ;;  %v830_v7 = vadd.f32 %v829_v48, %v828_v30  ;;  %v815_v18 = vrot.slane %v814_v56, 2  ;;  %v1471_v48 = vld [vmem:[%s2150_s3 + $0x38] sm:$0xff] }
  0xd4   : > { %v893_v27 = vadd.f32 %v892_v21, %v891_v14  ;;  %v1855_v31 = vpop.f32.mrf.mxu1  ;;  %1241 = vmatpush.bf16.msrb.mxu1 %v1471_v48 }
  0xd5   : > { %v1826_v29 = vsel %vm1004_vm2, %v940_v22, %v1003_v45  ;;  %v735_v32 = vadd.f32 %v657_v25, %v656_v24  ;;  %v1047_v33 = vpack.c.bf16 %v940_v22, %v940_v22  ;;  %v831_v22 = vrot.slane %v830_v7, 1 }
  0xd6   : > { %v894_v36 = vrot.slane %v893_v27, 1  ;;  %v577_v40 = vpop.f32.mrf.mxu2  ;;  %v668_v24 = vmax.f32 %v536_v4, 0.0  ;;  %v1865_v38 = vadd.f32 %v815_v18, %v814_v56  ;;  %v671_v56 = vmax.f32 %v543_v37, 0.0 }
  0xd7   : > { %v736_v39 = vrot.slane %v735_v32, 4  ;;  %v622_v41 = vpop.f32.mrf.mxu3  ;;  %v578_v44 = vadd.f32 %v1779_v35, %v577_v40  ;;  %v1131_v51 = vunpack.c.l.b16 %v1047_v33  ;;  %v832_v40 = vadd.f32 %v831_v22, %v830_v7 }
  0xd8   : > { %v895_v42 = vadd.f32 %v894_v36, %v893_v27  ;;  %v623_v45 = vadd.f32 %v1779_v35, %v622_v41  ;;  %v1833_v46 = vpop.f32.mrf.mxu0  ;;  %v541_v36 = vadd.f32 %v1779_v35, %v1807_v34 }
  0xd9   : > { %v737_v50 = vadd.f32 %v736_v39, %v735_v32  ;;  %v685_v53 = vmax.f32 %v578_v44, 0.0  ;;  %v1846_v57 = vsel %vm1004_vm2, %v1131_v51, %v1818_v62  ;;  %v1867_v39 = vadd.f32 %v878_v19, %v877_v60 }
  0xda   : > { %v963_v52 = vmul.f32 0.0625, %v895_v42  ;;  %v703_v54 = vmax.f32 %v623_v45, 0.0 }
  0xdb   : > { %v738_v59 = vrot.slane %v737_v50, 2  ;;  %v833_v2 = vadd.f32 %v685_v53, %v684_v43 }
  0xdc   : > { %v1840_v63 = vsel %vm1002_vm1, %v963_v52, %v962_v26  ;;  %v1070_v1 = vpack.c.bf16 %v963_v52, %v963_v52  ;;  %v896_v6 = vadd.f32 %v703_v54, %v702_v49  ;;  %v669_v26 = vmax.f32 %v538_v58, 0.0 }
  0xdd   : > { %v739_v5 = vadd.f32 %v738_v59, %v737_v50  ;;  %v834_v9 = vrot.slane %v833_v2, 4  ;;  %v820_v52 = vrot.slane %v1804_v23, 4  ;;  %v670_v54 = vmax.f32 %v541_v36, 0.0 }
  0xde   : > { %v1154_v8 = vunpack.c.l.b16 %v1070_v1  ;;  %v897_v11 = vrot.slane %v896_v6, 4  ;;  %v580_v12 = vpop.f32.mrf.mxu2  ;;  %v777_v43 = vadd.f32 %v669_v26, %v668_v24  ;;  %v954_v59 = vmul.f32 0.0625, %v832_v40 }
  0xdf   : > { %v740_v10 = vrot.slane %v739_v5, 1  ;;  %v625_v13 = vpop.f32.mrf.mxu3  ;;  %v835_v14 = vadd.f32 %v834_v9, %v833_v2  ;;  %v581_v17 = vadd.f32 %v1779_v35, %v580_v12 }
  0xe0   : > { %v512_v15 = vpop.f32.mrf.mxu0  ;;  %v1851_v0 = vsel %vm1002_vm1, %v1154_v8, %v1153_v3  ;;  %v898_v21 = vadd.f32 %v897_v11, %v896_v6  ;;  %v626_v30 = vadd.f32 %v1779_v35, %v625_v13  ;;  %v548_v6 = vadd.f32 %v1779_v35, %v1835_v55 }
  0xe1   : > { %v741_v20 = vadd.f32 %v740_v10, %v739_v5  ;;  %v836_v62 = vrot.slane %v835_v14, 2  ;;  %v686_v45 = vmax.f32 %v581_v17, 0.0  ;;  %v546_v5 = vadd.f32 %v1779_v35, %v1821_v16 }
  0xe2   : > { %v899_v27 = vrot.slane %v898_v21, 2  ;;  %v704_v49 = vmax.f32 %v626_v30, 0.0  ;;  %v778_v58 = vrot.slane %v777_v43, 4  ;;  %v513_v12 = vadd.f32 %v1779_v35, %v512_v15 }
  0xe3   : > { %v941_v25 = vmul.f32 0.0625, %v741_v20  ;;  %v837_v28 = vadd.f32 %v836_v62, %v835_v14  ;;  %v784_v13 = vadd.f32 %v671_v56, %v670_v54  ;;  %v1061_v14 = vpack.c.bf16 %v954_v59, %v954_v59  ;;  %v552_v20 = vpop.f32.mrf.mxu1 }
  0xe4   : > { %v900_v33 = vadd.f32 %v899_v27, %v898_v21  ;;  %v511_v55 = vadd.f32 %v1779_v35, %v1833_v46  ;;  %v672_v21 = vmax.f32 %v546_v5, 0.0  ;;  %v673_v62 = vmax.f32 %v548_v6, 0.0 }
  0xe5   : > { %v1859_v32 = vsel %vm1006_vm3, %v941_v25, %v1826_v29  ;;  %v838_v41 = vrot.slane %v837_v28, 1  ;;  %v1048_v42 = vpack.c.bf16 %v941_v25, %v941_v25  ;;  %v817_v25 = vrot.slane %v1865_v38, 1 }
  0xe6   : > { %v901_v44 = vrot.slane %v900_v33, 1  ;;  %v582_v47 = vpop.f32.mrf.mxu2  ;;  %v779_v30 = vadd.f32 %v778_v58, %v777_v43  ;;  %v1145_v36 = vunpack.c.l.b16 %v1061_v14 }
  0xe7   : > { %v627_v29 = vpop.f32.mrf.mxu3  ;;  %v839_v34 = vadd.f32 %v838_v41, %v837_v28  ;;  %v583_v61 = vadd.f32 %v1779_v35, %v582_v47  ;;  %v1132_v3 = vunpack.c.l.b16 %v1048_v42  ;;  %v821_v28 = vadd.f32 %v820_v52, %v1804_v23 }
  0xe8   : > { %v628_v50 = vadd.f32 %v1779_v35, %v627_v29  ;;  %v1874_v51 = vpop.f32.mrf.mxu0  ;;  %v902_v53 = vadd.f32 %v901_v44, %v900_v33  ;;  %v659_v33 = vmax.f32 %v513_v12, 0.0  ;;  %v880_v42 = vrot.slane %v1867_v39, 1 }
  0xe9   : > { %v955_v60 = vmul.f32 0.0625, %v839_v34  ;;  %v687_v1 = vmax.f32 %v583_v61, 0.0  ;;  %v1900_v15 = vsel %vm1006_vm3, %v1132_v3, %v1846_v57  ;;  %v658_v44 = vmax.f32 %v511_v55, 0.0 }
  0xea   : > { %v705_v2 = vmax.f32 %v628_v50, 0.0  ;;  %v964_v4 = vmul.f32 0.0625, %v902_v53  ;;  %v785_v57 = vrot.slane %v784_v13, 4  ;;  %v818_v47 = vadd.f32 %v817_v25, %v1865_v38 }
  0xeb   : > { %v1882_v7 = vsel %vm1002_vm1, %v955_v60, %v954_v59  ;;  %v1062_v8 = vpack.c.bf16 %v955_v60, %v955_v60  ;;  %v840_v9 = vadd.f32 %v687_v1, %v686_v45  ;;  %v791_v45 = vadd.f32 %v673_v62, %v672_v21 }
  0xec   : > { %v903_v10 = vadd.f32 %v705_v2, %v704_v49  ;;  %v1886_v11 = vsel %vm1004_vm2, %v964_v4, %v1840_v63  ;;  %v1071_v18 = vpack.c.bf16 %v964_v4, %v964_v4  ;;  %v1470_v63 = vld [vmem:[%s2150_s3 + $0x30] sm:$0xff]  ;;  %v822_v49 = vrot.slane %v821_v28, 2 }
  0xed   : > { %v841_v16 = vrot.slane %v840_v9, 4  ;;  %v1146_v26 = vunpack.c.l.b16 %v1062_v8  ;;  %1242 = vmatpush.bf16.msrb.mxu1 %v1470_v63  ;;  %v742_v23 = vadd.f32 %v659_v33, %v658_v44  ;;  %v780_v61 = vrot.slane %v779_v30, 2 }
  0xee   : > { %v904_v19 = vrot.slane %v903_v10, 4  ;;  %v1891_v22 = vpop.f32.mrf.mxu2  ;;  %v1155_v37 = vunpack.c.l.b16 %v1071_v18  ;;  %v881_v54 = vadd.f32 %v880_v42, %v1867_v39  ;;  %v786_v56 = vadd.f32 %v785_v57, %v784_v13  ;;  %v555_v39 = vpop.f32.mrf.mxu1 }
  0xef   : > { %v1893_v24 = vpop.f32.mrf.mxu3  ;;  %v842_v27 = vadd.f32 %v841_v16, %v840_v9  ;;  %v1175_v34 = vsel %vm1002_vm1, %v1146_v26, %v1145_v36  ;;  %v516_v38 = vadd.f32 %v1779_v35, %v1874_v51  ;;  %v792_v59 = vrot.slane %v791_v45, 4 }
  0xf0   : > { %v905_v17 = vadd.f32 %v904_v19, %v903_v10  ;;  %v517_v46 = vpop.f32.mrf.mxu0  ;;  %v1910_v53 = vsel %vm1004_vm2, %v1155_v37, %v1851_v0  ;;  %v1915_v2 = vmul.f32 0.0625, %v818_v47  ;;  %v743_v6 = vrot.slane %v742_v23, 4 }
  0xf1   : > { %v843_v40 = vrot.slane %v842_v27, 2  ;;  %v518_v43 = vadd.f32 %v1779_v35, %v517_v46  ;;  %v551_v0 = vadd.f32 %v1779_v35, %v1855_v31  ;;  %v553_v9 = vadd.f32 %v1779_v35, %v552_v20 }
  0xf2   : > { %v906_v41 = vrot.slane %v905_v17, 2  ;;  %v823_v10 = vadd.f32 %v822_v49, %v821_v28  ;;  %v781_v58 = vadd.f32 %v780_v61, %v779_v30  ;;  %v787_v13 = vrot.slane %v786_v56, 2 }
  0xf3   : > { %v844_v29 = vadd.f32 %v843_v40, %v842_v27  ;;  %v661_v8 = vmax.f32 %v518_v43, 0.0  ;;  %v660_v14 = vmax.f32 %v516_v38, 0.0  ;;  %v793_v18 = vadd.f32 %v792_v59, %v791_v45 }
  0xf4   : > { %v907_v48 = vadd.f32 %v906_v41, %v905_v17  ;;  %v1920_v16 = vmul.f32 0.0625, %v881_v54  ;;  %v744_v21 = vadd.f32 %v743_v6, %v742_v23  ;;  %v674_v63 = vmax.f32 %v551_v0, 0.0 }
  0xf5   : > { %v845_v50 = vrot.slane %v844_v29, 1  ;;  %v749_v62 = vadd.f32 %v661_v8, %v660_v14  ;;  %v675_v25 = vmax.f32 %v553_v9, 0.0  ;;  %v824_v26 = vrot.slane %v823_v10, 1  ;;  %v1468_v8 = vld [vmem:[%s2150_s3 + $0x20] sm:$0xff] }
  0xf6   : > { %v908_v52 = vrot.slane %v907_v48, 1  ;;  %v587_v60 = vpop.f32.mrf.mxu2  ;;  %v782_v27 = vrot.slane %v781_v58, 1  ;;  %v586_v46 = vadd.f32 %v1779_v35, %v1891_v22  ;;  %v788_v28 = vadd.f32 %v787_v13, %v786_v56  ;;  %v557_v54 = vpop.f32.mrf.mxu1 }
  0xf7   : > { %v632_v1 = vpop.f32.mrf.mxu3  ;;  %v846_v3 = vadd.f32 %v845_v50, %v844_v29  ;;  %v588_v30 = vadd.f32 %v1779_v35, %v587_v60  ;;  %v794_v41 = vrot.slane %v793_v18, 2  ;;  %v745_v57 = vrot.slane %v744_v21, 2 }
  0xf8   : > { %v909_v4 = vadd.f32 %v908_v52, %v907_v48  ;;  %v520_v5 = vpop.f32.mrf.mxu0  ;;  %v633_v33 = vadd.f32 %v1779_v35, %v632_v1  ;;  %v750_v45 = vrot.slane %v749_v62, 4  ;;  %v1059_v29 = vpack.c.bf16 %v1915_v2, %v1915_v2 }
  0xf9   : > { %v956_v12 = vmul.f32 0.0625, %v846_v3  ;;  %v521_v42 = vadd.f32 %v1779_v35, %v520_v5  ;;  %v825_v48 = vadd.f32 %v824_v26, %v823_v10  ;;  %v783_v49 = vadd.f32 %v782_v27, %v781_v58 }
  0xfa   : > { %v965_v51 = vmul.f32 0.0625, %v909_v4  ;;  %v688_v23 = vmax.f32 %v586_v46, 0.0  ;;  %v689_v61 = vmax.f32 %v588_v30, 0.0  ;;  %v707_v50 = vmax.f32 %v633_v33, 0.0 }
  0xfb   : > { %v1924_v19 = vsel %vm1004_vm2, %v956_v12, %v1882_v7  ;;  %v1063_v55 = vpack.c.bf16 %v956_v12, %v956_v12  ;;  %v1469_v7 = vld [vmem:[%s2150_s3 + $0x28] sm:$0xff]  ;;  %v789_v56 = vrot.slane %v788_v28, 1  ;;  %v662_v38 = vmax.f32 %v521_v42, 0.0 }
  0xfc   : > { %v1928_v31 = vsel %vm1006_vm3, %v965_v51, %v1886_v11  ;;  %v1072_v20 = vpack.c.bf16 %v965_v51, %v965_v51  ;;  %v631_v11 = vadd.f32 %v1779_v35, %v1893_v24  ;;  %1243 = vmatpush.bf16.msrb.mxu1 %v1469_v7  ;;  %v798_v24 = vadd.f32 %v675_v25, %v674_v63 }
  0xfd   : > { %v1147_v17 = vunpack.c.l.b16 %v1063_v55  ;;  %v746_v60 = vadd.f32 %v745_v57, %v744_v21  ;;  %v751_v1 = vadd.f32 %v750_v45, %v749_v62  ;;  %v795_v3 = vadd.f32 %v794_v41, %v793_v18  ;;  %v1467_v57 = vld [vmem:[%s2150_s3 + $0x18] sm:$0xff] }
  0xfe   : > { %v590_v36 = vpop.f32.mrf.mxu2  ;;  %v1156_v40 = vunpack.c.l.b16 %v1072_v20  ;;  %v706_v43 = vmax.f32 %v631_v11, 0.0  ;;  %v799_v4 = vrot.slane %v798_v24, 4  ;;  %v556_v6 = vadd.f32 %v1779_v35, %v555_v39 }
  0xff   : > { %v635_v37 = vpop.f32.mrf.mxu3  ;;  %v1941_v22 = vsel %vm1004_vm2, %v1147_v17, %v1175_v34  ;;  %v1068_v34 = vpack.c.bf16 %v1920_v16, %v1920_v16  ;;  %v558_v0 = vadd.f32 %v1779_v35, %v557_v54  ;;  %v1957_v9 = vunpack.c.l.b16 %v1059_v29 }
 0x100   : > { %v522_v44 = vpop.f32.mrf.mxu0  ;;  %v1950_v59 = vsel %vm1006_vm3, %v1156_v40, %v1910_v53  ;;  %v1959_v10 = vmul.f32 0.0625, %v825_v48  ;;  %v1961_v58 = vmul.f32 0.0625, %v783_v49  ;;  %v847_v53 = vadd.f32 %v689_v61, %v688_v23  ;;  %1244 = vmatpush.bf16.msrb.mxu1 %v1468_v8 }
 0x101   : > { %v523_v47 = vadd.f32 %v1779_v35, %v522_v44  ;;  %v910_v12 = vadd.f32 %v707_v50, %v706_v43  ;;  %v790_v14 = vadd.f32 %v789_v56, %v788_v28  ;;  %v591_v18 = vadd.f32 %v1779_v35, %v590_v36 }
 0x102   : > { %v747_v21 = vrot.slane %v746_v60, 1  ;;  %v752_v62 = vrot.slane %v751_v1, 2  ;;  %v796_v63 = vrot.slane %v795_v3, 1  ;;  %v800_v25 = vadd.f32 %v799_v4, %v798_v24 }
 0x103   : > { %v663_v52 = vmax.f32 %v523_v47, 0.0  ;;  %v636_v26 = vadd.f32 %v1779_v35, %v635_v37  ;;  %v676_v17 = vmax.f32 %v556_v6, 0.0  ;;  %v677_v46 = vmax.f32 %v558_v0, 0.0 }
 0x104   : > { %v1054_v7 = vpack.c.bf16 %v1961_v58, %v1961_v58  ;;  %v848_v28 = vrot.slane %v847_v53, 4  ;;  %v911_v11 = vrot.slane %v910_v12, 4  ;;  %v1060_v30 = vpack.c.bf16 %v1959_v10, %v1959_v10  ;;  %1245 = vmatpush.bf16.msrb.mxu1 %v1467_v57 }
 0x105   : > { %v756_v5 = vadd.f32 %v663_v52, %v662_v38  ;;  %v1971_v33 = vmul.f32 0.0625, %v790_v14  ;;  %v690_v36 = vmax.f32 %v591_v18, 0.0  ;;  %v748_v42 = vadd.f32 %v747_v21, %v746_v60 }
 0x106   : > { %v592_v51 = vpop.f32.mrf.mxu2  ;;  %v797_v44 = vadd.f32 %v796_v63, %v795_v3  ;;  %v801_v37 = vrot.slane %v800_v25, 2  ;;  %v1976_v45 = vunpack.c.l.b16 %v1068_v34  ;;  %v753_v47 = vadd.f32 %v752_v62, %v751_v1 }
 0x107   : > { %v637_v13 = vpop.f32.mrf.mxu3  ;;  %v757_v39 = vrot.slane %v756_v5, 4  ;;  %v593_v55 = vadd.f32 %v1779_v35, %v592_v51  ;;  %v708_v24 = vmax.f32 %v636_v26, 0.0  ;;  %v805_v48 = vadd.f32 %v677_v46, %v676_v17 }
 0x108   : > { %v525_v20 = vpop.f32.mrf.mxu0  ;;  %v638_v27 = vadd.f32 %v1779_v35, %v637_v13  ;;  %v1978_v49 = vunpack.c.l.b16 %v1054_v7  ;;  %v849_v23 = vadd.f32 %v848_v28, %v847_v53  ;;  %v912_v43 = vadd.f32 %v911_v11, %v910_v12 }
 0x109   : > { %v758_v40 = vadd.f32 %v757_v39, %v756_v5  ;;  %v691_v41 = vmax.f32 %v593_v55, 0.0  ;;  %v526_v61 = vadd.f32 %v1779_v35, %v525_v20  ;;  %v1055_v54 = vpack.c.bf16 %v1971_v33, %v1971_v33 }
 0x10a   : > { %v709_v29 = vmax.f32 %v638_v27, 0.0  ;;  %v1983_v60 = vunpack.c.l.b16 %v1060_v30  ;;  %v1985_v1 = vmul.f32 0.0625, %v797_v44  ;;  %v802_v3 = vadd.f32 %v801_v37, %v800_v25 }
 0x10b   : > { %v759_v56 = vrot.slane %v758_v40, 2  ;;  %v854_v38 = vadd.f32 %v691_v41, %v690_v36  ;;  %v1988_v5 = vmul.f32 0.0625, %v748_v42  ;;  %v754_v6 = vrot.slane %v753_v47, 1  ;;  %v1466_v36 = vld [vmem:[%s2150_s3 + $0x10] sm:$0xff] }
 0x10c   : > { %v917_v8 = vadd.f32 %v709_v29, %v708_v24  ;;  %v806_v0 = vrot.slane %v805_v48, 4  ;;  %v850_v53 = vrot.slane %v849_v23, 2  ;;  %v913_v12 = vrot.slane %v912_v43, 2  ;;  %1246 = vmatpush.bf16.msrb.mxu1 %v1466_v36 }
 0x10d   : > { %v664_v51 = vmax.f32 %v526_v61, 0.0  ;;  %v1990_v14 = vunpack.c.l.b16 %v1055_v54  ;;  %v760_v18 = vadd.f32 %v759_v56, %v758_v40  ;;  %v855_v39 = vrot.slane %v854_v38, 4  ;;  %v1465_v56 = vld [vmem:[%s2150_s3 + $0x8] sm:$0xff] }
 0x10e   : > { %v595_v50 = vpop.f32.mrf.mxu2  ;;  %v803_v55 = vrot.slane %v802_v3, 1  ;;  %v1009_v63 = vsel %vm1008_vm4, %v1988_v5, %v1859_v32  ;;  %v1056_v25 = vpack.c.bf16 %v1985_v1, %v1985_v1  ;;  %v918_v26 = vrot.slane %v917_v8, 4 }
 0x10f   : > { %v640_v52 = vpop.f32.mrf.mxu3  ;;  %v596_v20 = vadd.f32 %v1779_v35, %v595_v50  ;;  %v807_v27 = vadd.f32 %v806_v0, %v805_v48  ;;  %v755_v17 = vadd.f32 %v754_v6, %v753_v47  ;;  %v851_v46 = vadd.f32 %v850_v53, %v849_v23 }
 0x110   : > { %v527_v34 = vpop.f32.mrf.mxu0  ;;  %v641_v21 = vadd.f32 %v1779_v35, %v640_v52  ;;  %v914_v7 = vadd.f32 %v913_v12, %v912_v43  ;;  %v761_v40 = vrot.slane %v760_v18, 1  ;;  %v856_v41 = vadd.f32 %v855_v39, %v854_v38  ;;  %1247 = vmatpush.bf16.msrb.mxu1 %v1465_v56 }
 0x111   : > { %v528_v4 = vadd.f32 %v1779_v35, %v527_v34  ;;  %v804_v37 = vadd.f32 %v803_v55, %v802_v3  ;;  %v692_v57 = vmax.f32 %v596_v20, 0.0  ;;  %v919_v29 = vadd.f32 %v918_v26, %v917_v8 }
 0x112   : > { %v710_v47 = vmax.f32 %v641_v21, 0.0  ;;  %v808_v48 = vrot.slane %v807_v27, 2  ;;  %v1049_v61 = vpack.c.bf16 %v1988_v5, %v1988_v5  ;;  %v943_v50 = vmul.f32 0.0625, %v755_v17  ;;  %v1464_v5 = vld [vmem:[%s2150_s3] sm:$0xff] }
 0x113   : > { %v665_v13 = vmax.f32 %v528_v4, 0.0  ;;  %v2006_v52 = vunpack.c.l.b16 %v1056_v25  ;;  %v852_v38 = vrot.slane %v851_v46, 1  ;;  %v915_v34 = vrot.slane %v914_v7, 1 }
 0x114   : > { %v762_v3 = vadd.f32 %v761_v40, %v760_v18  ;;  %v857_v4 = vrot.slane %v856_v41, 2  ;;  %v2011_v6 = vmul.f32 0.0625, %v804_v37  ;;  %v920_v12 = vrot.slane %v919_v29, 2  ;;  %1248 = vmatpush.bf16.msrb.mxu1 %v1464_v5 }
 0x115   : > { %v763_v62 = vadd.f32 %v665_v13, %v664_v51  ;;  %v809_v51 = vadd.f32 %v808_v48, %v807_v27  ;;  %v1011_v18 = vsel %vm1010_vm5, %v943_v50, %v1009_v63  ;;  %v853_v25 = vadd.f32 %v852_v38, %v851_v46 }
 0x116   : > { %v597_v11 = vpop.f32.mrf.mxu2  ;;  %v916_v26 = vadd.f32 %v915_v34, %v914_v7  ;;  %v2019_v17 = vmul.f32 0.0625, %v762_v3  ;;  %v1050_v63 = vpack.c.bf16 %v943_v50, %v943_v50  ;;  %v1057_v56 = vpack.c.bf16 %v2011_v6, %v2011_v6 }
 0x117   : > { %v764_v28 = vrot.slane %v763_v62, 4  ;;  %v642_v30 = vpop.f32.mrf.mxu3  ;;  %v598_v42 = vadd.f32 %v1779_v35, %v597_v11 }
 0x118   : > { %v643_v32 = vadd.f32 %v1779_v35, %v642_v30  ;;  %v530_v44 = vpop.f32.mrf.mxu0  ;;  %v1134_v3 = vunpack.c.l.b16 %v1050_v63 }
 0x119   : > { %v765_v24 = vadd.f32 %v764_v28, %v763_v62  ;;  %v693_v23 = vmax.f32 %v598_v42, 0.0  ;;  %v531_v13 = vadd.f32 %v1779_v35, %v530_v44  ;;  %v858_v28 = vadd.f32 %v857_v4, %v856_v41 }
 0x11a   : > { %v711_v43 = vmax.f32 %v643_v32, 0.0  ;;  %v921_v42 = vadd.f32 %v920_v12, %v919_v29  ;;  %v810_v32 = vrot.slane %v809_v51, 1  ;;  %v1013_v41 = vsel %vm1012_vm6, %v2019_v17, %v1011_v18 }
 0x11b   : > { %v766_v54 = vrot.slane %v765_v24, 2  ;;  %v861_v0 = vadd.f32 %v693_v23, %v692_v57  ;;  %v666_v44 = vmax.f32 %v531_v13, 0.0  ;;  %v966_v23 = vmul.f32 0.0625, %v916_v26 }
 0x11c   : > { %v924_v53 = vadd.f32 %v711_v43, %v710_v47  ;;  %v957_v47 = vmul.f32 0.0625, %v853_v25  ;;  %v859_v43 = vrot.slane %v858_v28, 1  ;;  %v922_v38 = vrot.slane %v921_v42, 1 }
 0x11d   : > { %v767_v8 = vadd.f32 %v766_v54, %v765_v24  ;;  %v862_v55 = vrot.slane %v861_v0, 4  ;;  %v1133_v54 = vunpack.c.l.b16 %v1049_v61  ;;  %v811_v34 = vadd.f32 %v810_v32, %v809_v51 }
 0x11e   : > { %v925_v20 = vrot.slane %v924_v53, 4  ;;  %v600_v21 = vpop.f32.mrf.mxu2 }
 0x11f   : > { %v768_v39 = vrot.slane %v767_v8, 1  ;;  %v645_v62 = vpop.f32.mrf.mxu3  ;;  %v863_v36 = vadd.f32 %v862_v55, %v861_v0  ;;  %v601_v24 = vadd.f32 %v1779_v35, %v600_v21  ;;  %v1073_v55 = vpack.c.bf16 %v966_v23, %v966_v23 }
 0x120   : > { %v532_v11 = vpop.f32.mrf.mxu0  ;;  %v926_v27 = vadd.f32 %v925_v20, %v924_v53  ;;  %v646_v48 = vadd.f32 %v1779_v35, %v645_v62  ;;  %v860_v20 = vadd.f32 %v859_v43, %v858_v28  ;;  %v923_v62 = vadd.f32 %v922_v38, %v921_v42 }
 0x121   : > { %v769_v30 = vadd.f32 %v768_v39, %v767_v8  ;;  %v533_v40 = vadd.f32 %v1779_v35, %v532_v11  ;;  %v864_v46 = vrot.slane %v863_v36, 2  ;;  %v694_v12 = vmax.f32 %v601_v24, 0.0 }
 0x122   : > { %v927_v7 = vrot.slane %v926_v27, 2  ;;  %v712_v13 = vmax.f32 %v646_v48, 0.0  ;;  %v1064_v39 = vpack.c.bf16 %v957_v47, %v957_v47  ;;  %v951_v25 = vmul.f32 0.0625, %v811_v34 }
 0x123   : > { %v2024_v37 = vmul.f32 0.0625, %v769_v30  ;;  %v667_v57 = vmax.f32 %v533_v40, 0.0  ;;  %v865_v4 = vadd.f32 %v864_v46, %v863_v36  ;;  %v2041_v40 = vunpack.c.l.b16 %v1057_v56 }
 0x124   : > { %v928_v8 = vadd.f32 %v927_v7, %v926_v27  ;;  %v1164_v27 = vsel %vm1008_vm4, %v1133_v54, %v1900_v15  ;;  %v1157_v28 = vunpack.c.l.b16 %v1073_v55  ;;  %v958_v46 = vmul.f32 0.0625, %v860_v20 }
 0x125   : > { %v1015_v29 = vsel %vm1014_vm7, %v2024_v37, %v1013_v41  ;;  %v770_v50 = vadd.f32 %v667_v57, %v666_v44  ;;  %v866_v11 = vrot.slane %v865_v4, 1  ;;  %v1148_v44 = vunpack.c.l.b16 %v1064_v39 }
 0x126   : > { %1041 = vst [vmem:[%s2034_s29] sm:$0xff] %v1015_v29  ;;  %v602_v53 = vpop.f32.mrf.mxu2  ;;  %v929_v30 = vrot.slane %v928_v8, 1  ;;  %v967_v7 = vmul.f32 0.0625, %v923_v62  ;;  %v1058_v57 = vpack.c.bf16 %v951_v25, %v951_v25  ;;  %v1051_v48 = vpack.c.bf16 %v2019_v17, %v2019_v17 }
 0x127   : > { %v771_v0 = vrot.slane %v770_v50, 4  ;;  %v647_v5 = vpop.f32.mrf.mxu3  ;;  %v603_v18 = vadd.f32 %v1779_v35, %v602_v53  ;;  %v867_v43 = vadd.f32 %v866_v11, %v865_v4  ;;  %v1033_v54 = vsel %vm1008_vm4, %v966_v23, %v1928_v31 }
 0x128   : > { %v648_v61 = vadd.f32 %v1779_v35, %v647_v5  ;;  %v2044_v35 = vsel %vm1010_vm5, %v1134_v3, %v1164_v27  ;;  %v930_v15 = vadd.f32 %v929_v30, %v928_v8  ;;  %v1065_v34 = vpack.c.bf16 %v958_v46, %v958_v46 }
 0x129   : > { %v772_v21 = vadd.f32 %v771_v0, %v770_v50  ;;  %v695_v26 = vmax.f32 %v603_v18, 0.0  ;;  %v1025_v50 = vsel %vm1006_vm3, %v957_v47, %v1924_v19  ;;  %v1177_v0 = vsel %vm1006_vm3, %v1148_v44, %v1941_v22 }
 0x12a   : > { %v713_v51 = vmax.f32 %v648_v61, 0.0  ;;  %v1185_v53 = vsel %vm1008_vm4, %v1157_v28, %v1950_v59  ;;  %v1074_v17 = vpack.c.bf16 %v967_v7, %v967_v7  ;;  %v1142_v4 = vunpack.c.l.b16 %v1058_v57 }
 0x12b   : > { %v773_v36 = vrot.slane %v772_v21, 2  ;;  %v868_v63 = vadd.f32 %v695_v26, %v694_v12  ;;  %v959_v12 = vmul.f32 0.0625, %v867_v43  ;;  %v1135_v47 = vunpack.c.l.b16 %v1051_v48 }
 0x12c   : > { %v931_v32 = vadd.f32 %v713_v51, %v712_v13  ;;  %v968_v13 = vmul.f32 0.0625, %v930_v15  ;;  %v1026_v31 = vsel %vm1008_vm4, %v958_v46, %v1025_v50  ;;  %v1052_v61 = vpack.c.bf16 %v2024_v37, %v2024_v37 }
 0x12d   : > { %v774_v42 = vadd.f32 %v773_v36, %v772_v21  ;;  %v869_v41 = vrot.slane %v868_v63, 4  ;;  %v1149_v39 = vunpack.c.l.b16 %v1065_v34  ;;  %v1034_v22 = vsel %vm1010_vm5, %v967_v7, %v1033_v54 }
 0x12e   : > { %v932_v24 = vrot.slane %v931_v32, 4  ;;  %v1158_v26 = vunpack.c.l.b16 %v1074_v17  ;;  %v1066_v51 = vpack.c.bf16 %v959_v12, %v959_v12  ;;  %v1075_v36 = vpack.c.bf16 %v968_v13, %v968_v13 }
 0x12f   : > { %v775_v29 = vrot.slane %v774_v42, 1  ;;  %v870_v56 = vadd.f32 %v869_v41, %v868_v63 }
 0x130   : > { %v933_v38 = vadd.f32 %v932_v24, %v931_v32  ;;  %v1136_v32 = vunpack.c.l.b16 %v1052_v61  ;;  %v1150_v57 = vunpack.c.l.b16 %v1066_v51  ;;  %v1159_v41 = vunpack.c.l.b16 %v1075_v36 }
 0x131   : > { %v776_v3 = vadd.f32 %v775_v29, %v774_v42  ;;  %v871_v8 = vrot.slane %v870_v56, 2  ;;  %v1178_v29 = vsel %vm1008_vm4, %v1149_v39, %v1177_v0  ;;  %v1186_v50 = vsel %vm1010_vm5, %v1158_v26, %v1185_v53 }
 0x132   : > { %v934_v5 = vrot.slane %v933_v38, 2  ;;  %v1187_v34 = vsel %vm1012_vm6, %v1159_v41, %v1186_v50 }
 0x133   : > { %v946_v19 = vmul.f32 0.0625, %v776_v3  ;;  %v872_v23 = vadd.f32 %v871_v8, %v870_v56 }
 0x134   : > { %v935_v18 = vadd.f32 %v934_v5, %v933_v38 }
 0x135   : > { %v1016_v59 = vsel %vm1002_vm1, %v1961_v58, %v946_v19  ;;  %v1053_v55 = vpack.c.bf16 %v946_v19, %v946_v19  ;;  %v873_v21 = vrot.slane %v872_v23, 1  ;;  %v1027_v58 = vsel %vm1010_vm5, %v959_v12, %v1026_v31 }
 0x136   : > { %v1017_v20 = vsel %vm1004_vm2, %v1971_v33, %v1016_v59  ;;  %v936_v62 = vrot.slane %v935_v18, 1  ;;  %v1035_v33 = vsel %vm1012_vm6, %v968_v13, %v1034_v22 }
 0x137   : > { %v1018_v11 = vsel %vm1006_vm3, %v1985_v1, %v1017_v20  ;;  %v1137_v30 = vunpack.c.l.b16 %v1053_v55  ;;  %v874_v27 = vadd.f32 %v873_v21, %v872_v23 }
 0x138   : > { %v1019_v37 = vsel %vm1008_vm4, %v2011_v6, %v1018_v11  ;;  %v937_v63 = vadd.f32 %v936_v62, %v935_v18 }
 0x139   : > { %v1020_v44 = vsel %vm1010_vm5, %v951_v25, %v1019_v37  ;;  %v1168_v28 = vsel %vm1002_vm1, %v1978_v49, %v1137_v30  ;;  %v960_v46 = vmul.f32 0.0625, %v874_v27 }
 0x13a   : > { %v1169_v1 = vsel %vm1004_vm2, %v1990_v14, %v1168_v28  ;;  %v969_v42 = vmul.f32 0.0625, %v937_v63  ;;  %v1021_v6 = vsel %vm1012_vm6, %v1915_v2, %v1020_v44  ;;  %v1166_v2 = vsel %vm1012_vm6, %v1135_v47, %v2044_v35 }
 0x13b   : > { %v1170_v7 = vsel %vm1006_vm3, %v2006_v52, %v1169_v1  ;;  %v1022_v25 = vsel %vm1014_vm7, %v1959_v10, %v1021_v6  ;;  %v1028_v49 = vsel %vm1012_vm6, %v960_v46, %v1027_v58  ;;  %v1067_v48 = vpack.c.bf16 %v960_v46, %v960_v46 }
 0x13c   : > { %v1171_v24 = vsel %vm1008_vm4, %v2041_v40, %v1170_v7  ;;  %v1036_v14 = vsel %vm1014_vm7, %v969_v42, %v1035_v33  ;;  %1042 = vst [vmem:[%s2034_s29 + $0x8] sm:$0xff] %v1022_v25  ;;  %v1029_v52 = vsel %vm1014_vm7, %v1920_v16, %v1028_v49  ;;  %v1076_v15 = vpack.c.bf16 %v969_v42, %v969_v42 }
 0x13d   : > { %v1172_v43 = vsel %vm1010_vm5, %v1142_v4, %v1171_v24  ;;  %1044 = vst [vmem:[%s2034_s29 + $0x18] sm:$0xff] %v1036_v14  ;;  %v1151_v40 = vunpack.c.l.b16 %v1067_v48  ;;  %v1167_v35 = vsel %vm1014_vm7, %v1136_v32, %v1166_v2  ;;  %v1179_v16 = vsel %vm1010_vm5, %v1150_v57, %v1178_v29 }
 0x13e   : > { %v1173_v10 = vsel %vm1012_vm6, %v1957_v9, %v1172_v43  ;;  %1043 = vst [vmem:[%s2034_s29 + $0x10] sm:$0xff] %v1029_v52  ;;  %v1160_v56 = vunpack.c.l.b16 %v1076_v15 }
 0x13f   : > { %v1174_v54 = vsel %vm1014_vm7, %v1983_v60, %v1173_v10  ;;  %v1180_v9 = vsel %vm1012_vm6, %v1151_v40, %v1179_v16 }
 0x140   : > { %v1189_v38 = vpack.c.b16 %v1174_v54, %v1167_v35  ;;  %v1181_v3 = vsel %vm1014_vm7, %v1976_v45, %v1180_v9  ;;  %v1188_v0 = vsel %vm1014_vm7, %v1160_v56, %v1187_v34 }
 0x141   : > { %v1190_v53 = vpack.c.b16 %v1188_v0, %v1181_v3 }
 0x142   : > { %1249 = vmatmul.bf16.vlgmr.msrb.gmra.mxu1 %v1189_v38 }
 0x152   : > { %1254 = vmatmul.bf16.gmra.mxu1 %v1190_v53 }
 0x153   : > { %1549 = shalt.err (!%p1546_p3)
}
 0x154   : > { %s1586_s19 = smov 128   ;;  %s1587_s29 = smov 8   ;;  %v1521_v45 = vld [vmem:[%s2151_s4] ss:$0 sm:$0xff] }
 0x155   : > { %1479 = dma.vmem_to_hbm [thread:$0]  (%p1661_p5), %s1283_s13, 512, %s1285_s14, %s1265_s15, %s1586_s19, %s1586_s19, %s1587_s29  }
 0x156   : > { %s1383_s9 = sshll.u32 %s1644_s25, 2 }
 0x157   : > { %p262_p4 = scmp.lt.s32.totalorder %s1383_s9, 7 }
 0x159   : > { %s2163_s9 = smov (!%p262_p4, %s1383_s9), 7 }
 0x15a   : > { %s1384_s11 = sshll.u32 %s2163_s9, 3 }
 0x15b   : > { %s265_s17 = scalar_lea.vmem %s2153_s6, %s1384_s11 }
 0x1bf   : > { %v1250_v60 = vpop.f32.mrf.mxu1 }
 0x1c0   : > { %v1251_v17 = vadd.f32 %v1521_v45, %v1250_v60 }
 0x1c2   : > { %1260 = vst [vmem:[%s265_s17] sm:$0xff] %v1251_v17 }
 0x1c7   : > { %v1252_v4 = vpop.f32.mrf.mxu1 }
 0x1c8   : > { %v1253_v8 = vadd.f32 %v1521_v45, %v1252_v4 }
 0x1ca   : > { %1261 = vst [vmem:[%s265_s17 + $0x8] sm:$0xff] %v1253_v8 }
 0x1cf   : > { %v1255_v5 = vpop.f32.mrf.mxu1 }
 0x1d0   : > { %v1256_v12 = vadd.f32 %v1521_v45, %v1255_v5 }
 0x1d2   : > { %1262 = vst [vmem:[%s265_s17 + $0x10] sm:$0xff] %v1256_v12 }
 0x1d7   : > { %v1257_v13 = vpop.f32.mrf.mxu1 }
 0x1d8   : > { %v1258_v19 = vadd.f32 %v1521_v45, %v1257_v13 }
 0x1da   : > { %1263 = vst [vmem:[%s265_s17 + $0x18] sm:$0xff] %v1258_v19 }
 0x1db PF: > { %p1485_p5 = scmp.ge.s32.totalorder %s1584_s24, 2  ;;  %s1303_s25 = sand.u32 1, %s1572_s21  }
 0x1dc   : > { %s1304_s7 = scalar_lea.sflag [#allocation3], %s1303_s25 }
 0x1dd   : > { %p1482_p7 = pnand %p1485_p5, %p1665_p6 }
 0x1df   : > { %p1483_p8 = pneg %p1482_p7 }
 0x1e1   : > { %1567 = dma.done.wait (%p1483_p8), %s1304_s7, 512  }
 0x1e2   : > { %1569 = vsyncadd (%p1483_p8), %s1304_s7, 4294966784  ;;  %p17_p9 = scmp.ge.s32.totalorder %s1648_s27, 4   ;;  %s2156_s21 = smov %s1576_s22 }
 0x1e3   : > { %s2157_s22 = smov %s1580_s23  ;;  %s2158_s23 = smov %s1659_s30 }
 0x1e4   : > { %s2159_s24 = smov %s1648_s27  ;;  %19 = sbr.rel (!%p17_p9) target bundleno = 3 (0x3), region = 87 }
 0x1e9   :  { %1318 = vsyncpa [#allocation3], 1 }
 0x1ea   :  { %1320 = vsyncpa [#allocation3 + $0x1], 1 }

</bundles_post_ra>
